<compile_context>
chip_gen: v7x
topology: tpu7x:2x2x1
jax: 0.10.0
libtpu: 0.0.40
codegen_flags: <defaults>
</compile_context>

<pallas_src>
import functools

import jax
import jax.numpy as jnp
import numpy as np
from jax import lax
from jax.experimental import pallas as pl
from jax.experimental.pallas import tpu as pltpu

LEAKY_SLOPE = 0.01  # nn.LeakyReLU default negative_slope


def _leaky_relu(x):
    # max(x, a*x) == LeakyReLU(x) for 0 < a < 1 (2 VPU ops vs cmp+mul+select).
    return jnp.maximum(x, LEAKY_SLOPE * x)


def _round_up(x, m):
    return ((x + m - 1) // m) * m


def _choose_tiling(N, *, bc_target=2048, chunk_target=512):
    """Pick (grid_steps, lane_block, inner_chunk, padded_N)."""
    # Even number of grid steps (>= 2) so both v7x TensorCores get work.
    g = max(2, 2 * pl.cdiv(N, 2 * bc_target))
    bc = _round_up(pl.cdiv(N, g), 128)           # lane block, 128-multiple, <= bc_target
    chunk = bc
    for c in (chunk_target, 384, 256, 128):      # largest divisor of bc (128-multiple)
        if c <= bc and bc % c == 0:
            chunk = c
            break
    return g, bc, chunk, g * bc


def _pinn_kernel(x_ref, w1_ref, sp_ref, wh_ref, wlast_ref, o_ref, *,
                 n_hidden_mm, f_out, chunk, n_chunks, dot_dtype):
    """Feature-major MLP over one lane-block of the batch.

    x_ref    : (f_in_pad, bc)   inputs (+ constant-ones row), batch on lanes
    w1_ref   : (H, f_in_pad)    layer-1 weight, normalization + bias folded in
    sp_ref   : (H, n_bias)      hidden biases + (zero-padded) final bias, f32
    wh_ref   : (n_hidden, H, H) hidden weights, PyTorch (out, in) layout
    wlast_ref: (f_out, H)       final weight
    o_ref    : (f_out, bc)      output, batch on lanes
    """
    # Hoist all parameter loads out of the inner chunk loop (a few vregs total).
    w1 = w1_ref[...]
    wh = [wh_ref[k] for k in range(n_hidden_mm)]
    w_last = wlast_ref[...]
    b_hid = [sp_ref[:, k:k + 1] for k in range(n_hidden_mm)]           # (H, 1)
    b_last = sp_ref[0:f_out, n_hidden_mm:n_hidden_mm + 1]               # (f_out, 1)

    def body(c, carry):
        start = pl.multiple_of(c * chunk, chunk)
        x = x_ref[:, pl.ds(start, chunk)]
        # Layer 1: normalization + bias folded in -> single bias-free MXU dot.
        h = jnp.dot(w1, x.astype(dot_dtype), preferred_element_type=jnp.float32)
        h = _leaky_relu(h)
        # Hidden layers: (H,H)@(H,chunk) MXU dots, f32 bias + LeakyReLU on the VPU.
        for k in range(n_hidden_mm):
            h = jnp.dot(wh[k], h.astype(dot_dtype),
                        preferred_element_type=jnp.float32)
            h = _leaky_relu(h + b_hid[k])
        # Final layer (no activation, matches forward()).
        out = jnp.dot(w_last, h.astype(dot_dtype),
                      preferred_element_type=jnp.float32) + b_last
        o_ref[:, pl.ds(start, chunk)] = out.astype(o_ref.dtype)
        return carry

    lax.fori_loop(0, n_chunks, body, None, unroll=True)


def pinn_forward(x, lb, ub, params, *, bc_target=2048, chunk_target=512,
                 dot_dtype=jnp.float32, out_dtype=jnp.float32):
    """PINN forward pass. x is (N, f_in) batch-major (PyTorch convention);
    returns (N, f_out). Transposes/padding are wrapper-side layout plumbing."""
    ws = [jnp.asarray(w, jnp.float32) for (w, _) in params]
    bs = [jnp.asarray(b, jnp.float32).reshape(-1) for (_, b) in params]
    n_layers = len(params)
    assert n_layers >= 3, "expects at least one hidden (H, H) layer"
    H = ws[0].shape[0]
    f_in = ws[0].shape[1]
    f_out = ws[-1].shape[0]
    assert all(w.shape == (H, H) for w in ws[1:-1])
    assert ws[-1].shape == (f_out, H) and f_out <= H
    N = x.shape[0]

    # Fold (x - lb)/(ub - lb) into layer 1, and fold b1 into an extra constant
    # "ones" input row so layer 1 needs no separate bias add.
    # NOTE: assumes ub > lb elementwise (same requirement as the reference).
    lb = jnp.asarray(lb, jnp.float32).reshape(-1)
    ub = jnp.asarray(ub, jnp.float32).reshape(-1)
    scale = 1.0 / (ub - lb)
    w1f = ws[0] * scale[None, :]                      # (H, f_in)
    b1f = bs[0] - w1f @ lb                            # (H,)
    f_in_pad = _round_up(f_in + 1, 8)
    w1_pad = (jnp.zeros((H, f_in_pad), jnp.float32)
              .at[:, :f_in].set(w1f)
              .at[:, f_in].set(b1f)).astype(dot_dtype)

    # Hidden biases + final bias (padded to H), columns on the lane axis.
    n_hidden = n_layers - 2
    b_last = jnp.zeros((H,), jnp.float32).at[:f_out].set(bs[-1])
    sp = jnp.stack(list(bs[1:-1]) + [b_last], axis=1)            # (H, n_hidden+1)

    wh = jnp.stack(ws[1:-1], axis=0).astype(dot_dtype)           # (n_hidden, H, H)
    w_last = ws[-1].astype(dot_dtype)                            # (f_out, H)

    # Feature-major, lane-dense batch layout, padded to the tile grid.
    g, bc, chunk, n_pad = _choose_tiling(N, bc_target=bc_target,
                                         chunk_target=chunk_target)
    n_chunks = bc // chunk
    x_t = (jnp.zeros((f_in_pad, n_pad), jnp.float32)
           .at[:f_in, :N].set(x.astype(jnp.float32).T)
           .at[f_in, :].set(1.0)).astype(dot_dtype)              # ones row = bias

    kernel = functools.partial(
        _pinn_kernel, n_hidden_mm=n_hidden, f_out=f_out,
        chunk=chunk, n_chunks=n_chunks, dot_dtype=dot_dtype)

    flops = 2 * n_pad * (f_in_pad * H + n_hidden * H * H + H * f_out)
    bytes_accessed = 4 * (n_pad * (f_in_pad + f_out)
                          + sum(int(w.size) for w in ws)
                          + sum(int(b.size) for b in bs))

    out_t = pl.pallas_call(
        kernel,
        out_shape=jax.ShapeDtypeStruct((f_out, n_pad), out_dtype),
        grid_spec=pltpu.PrefetchScalarGridSpec(
            num_scalar_prefetch=0,
            grid=(g,),
            in_specs=[
                pl.BlockSpec((f_in_pad, bc), lambda i: (0, i)),   # x^T lane tile
                pl.BlockSpec(w1_pad.shape, lambda i: (0, 0)),     # folded layer-1 W
                pl.BlockSpec(sp.shape, lambda i: (0, 0)),         # packed biases
                pl.BlockSpec(wh.shape, lambda i: (0, 0, 0)),      # hidden weights
                pl.BlockSpec(w_last.shape, lambda i: (0, 0)),     # final weight
            ],
            out_specs=pl.BlockSpec((f_out, bc), lambda i: (0, i)),
        ),
        compiler_params=pltpu.CompilerParams(
            dimension_semantics=("parallel",)),
        cost_estimate=pl.CostEstimate(flops=flops, transcendentals=0,
                                      bytes_accessed=bytes_accessed),
    )(x_t, w1_pad, sp, wh, w_last)

    return out_t[:, :N].T                                        # back to (N, f_out)


def init_pinn_params(layers, key):
    """Xavier-normal weights (like init_weights), PyTorch-default uniform biases.
    Weights kept in PyTorch nn.Linear layout (out_features, in_features)."""
    params = []
    for i in range(len(layers) - 1):
        fan_in, fan_out = layers[i], layers[i + 1]
        key, wk, bk = jax.random.split(key, 3)
        std = float(np.sqrt(2.0 / (fan_in + fan_out)))
        w = (std * jax.random.normal(wk, (fan_out, fan_in))).astype(jnp.float32)
        bound = 1.0 / float(np.sqrt(fan_in))
        b = jax.random.uniform(bk, (fan_out,), minval=-bound,
                               maxval=bound).astype(jnp.float32)
        params.append((w, b))
    return params


def pinn_forward_ref(x, lb, ub, params):
    """Pure-JAX reference (mirrors the PyTorch forward exactly)."""
    lb = lb.reshape(1, -1)
    ub = ub.reshape(1, -1)
    h = (x - lb) / (ub - lb)
    n = len(params)
    for i, (w, b) in enumerate(params):
        h = h @ w.T + b.reshape(1, -1)
        if i < n - 1:
            h = jnp.where(h > 0, h, LEAKY_SLOPE * h)
    return h


if __name__ == "__main__":
    # layers = [2, 32, 32, 32, 1]  (x, y) -> u, as in the Helmholtz PINN
    layers = [2, 32, 32, 32, 1]
    lb = jnp.array([-1.0, -1.0], dtype=jnp.float32)
    ub = jnp.array([1.0, 1.0], dtype=jnp.float32)

    key = jax.random.PRNGKey(0)
    key, pk = jax.random.split(key)
    params = init_pinn_params(layers, pk)

    # Aligned, ragged, and multi-chunk batches (exercise padding + inner loop).
    for N in (200, 256, 1152):
        key, xk = jax.random.split(key)
        x = jax.random.uniform(xk, (N, layers[0]), minval=-1.0,
                               maxval=1.0).astype(jnp.float32)
        out = jax.block_until_ready(pinn_forward(x, lb, ub, params))
        ref = pinn_forward_ref(x, lb, ub, params)
        np.testing.assert_allclose(np.asarray(out), np.asarray(ref),
                                   rtol=1e-4, atol=1e-5)

    # Optional bf16-MXU-operand path (v6e/v7x-friendly); loose tolerance by design.
    key, xk = jax.random.split(key)
    x = jax.random.uniform(xk, (384, layers[0]), minval=-1.0,
                           maxval=1.0).astype(jnp.float32)
    out = jax.block_until_ready(
        pinn_forward(x, lb, ub, params, dot_dtype=jnp.bfloat16))
    ref = pinn_forward_ref(x, lb, ub, params)
    np.testing.assert_allclose(np.asarray(out), np.asarray(ref),
                               rtol=5e-2, atol=5e-2)

    # TODO(synk): loss_BC / pde_loss / riesz_loss need autodiff through the
    # network (torch.autograd.grad); only the forward pass is kernelized here.
    print("KERNEL_OK")
</pallas_src>

<mosaic_0001>
module attributes {stable_mosaic.version = 11 : i64} {
  func.func @_pinn_kernel(%arg0: i32, %arg1: memref<8x128xf32, #tpu.memory_space<vmem>>, %arg2: memref<32x8xf32, #tpu.memory_space<vmem>>, %arg3: memref<32x3xf32, #tpu.memory_space<vmem>>, %arg4: memref<2x32x32xf32, #tpu.memory_space<vmem>>, %arg5: memref<1x32xf32, #tpu.memory_space<vmem>>, %arg6: memref<1x128xf32, #tpu.memory_space<vmem>>) attributes {dimension_semantics = [#tpu.dimension_semantics<parallel>], iteration_bounds = array<i64: 2>, scalar_prefetch = 0 : i64, scratch_operands = 0 : i64, tpu.core_type = #tpu.core_type<tc>, window_params = [{transform_indices = @transform_0, window_bounds = array<i64: 8, 128>}, {pipeline_mode = #tpu.pipeline_mode<synchronous>, transform_indices = @transform_1, window_bounds = array<i64: 32, 8>}, {pipeline_mode = #tpu.pipeline_mode<synchronous>, transform_indices = @transform_2, window_bounds = array<i64: 32, 3>}, {pipeline_mode = #tpu.pipeline_mode<synchronous>, transform_indices = @transform_3, window_bounds = array<i64: 2, 32, 32>}, {pipeline_mode = #tpu.pipeline_mode<synchronous>, transform_indices = @transform_4, window_bounds = array<i64: 1, 32>}, {transform_indices = @transform_5, window_bounds = array<i64: 1, 128>}]} {
    %c0 = arith.constant 0 : index
    %c0_0 = arith.constant 0 : index
    %0 = vector.load %arg2[%c0, %c0_0] : memref<32x8xf32, #tpu.memory_space<vmem>>, vector<32x8xf32>
    %c0_1 = arith.constant 0 : index
    %c0_2 = arith.constant 0 : index
    %c0_3 = arith.constant 0 : index
    %1 = vector.load %arg4[%c0_1, %c0_2, %c0_3] : memref<2x32x32xf32, #tpu.memory_space<vmem>>, vector<1x32x32xf32>
    %2 = vector.shape_cast %1 : vector<1x32x32xf32> to vector<32x32xf32>
    %c1 = arith.constant 1 : index
    %c0_4 = arith.constant 0 : index
    %c0_5 = arith.constant 0 : index
    %3 = vector.load %arg4[%c1, %c0_4, %c0_5] : memref<2x32x32xf32, #tpu.memory_space<vmem>>, vector<1x32x32xf32>
    %4 = vector.shape_cast %3 : vector<1x32x32xf32> to vector<32x32xf32>
    %c0_6 = arith.constant 0 : index
    %c0_7 = arith.constant 0 : index
    %5 = vector.load %arg5[%c0_6, %c0_7] : memref<1x32xf32, #tpu.memory_space<vmem>>, vector<1x32xf32>
    %c0_8 = arith.constant 0 : index
    %c0_9 = arith.constant 0 : index
    %6 = vector.load %arg3[%c0_8, %c0_9] : memref<32x3xf32, #tpu.memory_space<vmem>>, vector<32x1xf32>
    %c0_10 = arith.constant 0 : index
    %c1_11 = arith.constant 1 : index
    %7 = vector.load %arg3[%c0_10, %c1_11] : memref<32x3xf32, #tpu.memory_space<vmem>>, vector<32x1xf32>
    %c0_12 = arith.constant 0 : index
    %c2 = arith.constant 2 : index
    %8 = vector.load %arg3[%c0_12, %c2] : memref<32x3xf32, #tpu.memory_space<vmem>>, vector<1x1xf32>
    %c0_i32 = arith.constant 0 : i32
    %c128_i32 = arith.constant 128 : i32
    %9 = arith.muli %c0_i32, %c128_i32 : i32
    %10 = tpu.assume_multiple %9, 128 : i32
    %c0_13 = arith.constant 0 : index
    %11 = arith.index_cast %10 : i32 to index
    %12 = vector.load %arg1[%c0_13, %11] : memref<8x128xf32, #tpu.memory_space<vmem>>, vector<8x128xf32>
    %cst = arith.constant dense<0.000000e+00> : vector<32x128xf32>
    %13 = tpu.matmul %0, %12, %cst {dimension_numbers = #tpu.dot_dimension_numbers<[1], [0], [0], [1], [0, 0, 1, 1], [], []>} : vector<32x8xf32>, vector<8x128xf32>, vector<32x128xf32> -> vector<32x128xf32>
    %cst_14 = arith.constant 0.00999999977 : f32
    %14 = vector.broadcast %cst_14 : f32 to vector<32x128xf32>
    %15 = arith.mulf %14, %13 : vector<32x128xf32>
    %16 = arith.maximumf %13, %15 : vector<32x128xf32>
    %cst_15 = arith.constant dense<0.000000e+00> : vector<32x128xf32>
    %17 = tpu.matmul %2, %16, %cst_15 {dimension_numbers = #tpu.dot_dimension_numbers<[1], [0], [0], [1], [0, 0, 1, 1], [], []>} : vector<32x32xf32>, vector<32x128xf32>, vector<32x128xf32> -> vector<32x128xf32>
    %18 = vector.broadcast %6 : vector<32x1xf32> to vector<32x128xf32>
    %19 = arith.addf %17, %18 : vector<32x128xf32>
    %cst_16 = arith.constant 0.00999999977 : f32
    %20 = vector.broadcast %cst_16 : f32 to vector<32x128xf32>
    %21 = arith.mulf %20, %19 : vector<32x128xf32>
    %22 = arith.maximumf %19, %21 : vector<32x128xf32>
    %cst_17 = arith.constant dense<0.000000e+00> : vector<32x128xf32>
    %23 = tpu.matmul %4, %22, %cst_17 {dimension_numbers = #tpu.dot_dimension_numbers<[1], [0], [0], [1], [0, 0, 1, 1], [], []>} : vector<32x32xf32>, vector<32x128xf32>, vector<32x128xf32> -> vector<32x128xf32>
    %24 = vector.broadcast %7 : vector<32x1xf32> to vector<32x128xf32>
    %25 = arith.addf %23, %24 : vector<32x128xf32>
    %cst_18 = arith.constant 0.00999999977 : f32
    %26 = vector.broadcast %cst_18 : f32 to vector<32x128xf32>
    %27 = arith.mulf %26, %25 : vector<32x128xf32>
    %28 = arith.maximumf %25, %27 : vector<32x128xf32>
    %cst_19 = arith.constant dense<0.000000e+00> : vector<1x128xf32>
    %29 = tpu.matmul %5, %28, %cst_19 {dimension_numbers = #tpu.dot_dimension_numbers<[1], [0], [0], [1], [0, 0, 1, 1], [], []>} : vector<1x32xf32>, vector<32x128xf32>, vector<1x128xf32> -> vector<1x128xf32>
    %30 = vector.broadcast %8 : vector<1x1xf32> to vector<1x128xf32>
    %31 = arith.addf %29, %30 : vector<1x128xf32>
    %c0_20 = arith.constant 0 : index
    %32 = arith.index_cast %10 : i32 to index
    %33 = vector.load %arg6[%c0_20, %32] : memref<1x128xf32, #tpu.memory_space<vmem>>, vector<1x128xf32>
    tpu.vector_store %arg6[%c0_20, %32], %31 {strides = array<i32>} : memref<1x128xf32, #tpu.memory_space<vmem>>, vector<1x128xf32>,
    %c1_i32 = arith.constant 1 : i32
    return
  }
  func.func @transform_0(%arg0: i32) -> (i32, i32) {
    %c0_i32 = arith.constant 0 : i32
    %c0_i32_0 = arith.constant 0 : i32
    return %c0_i32, %arg0 : i32, i32
  }
  func.func @transform_1(%arg0: i32) -> (i32, i32) {
    %c0_i32 = arith.constant 0 : i32
    %c0_i32_0 = arith.constant 0 : i32
    %c0_i32_1 = arith.constant 0 : i32
    return %c0_i32, %c0_i32_0 : i32, i32
  }
  func.func @transform_2(%arg0: i32) -> (i32, i32) {
    %c0_i32 = arith.constant 0 : i32
    %c0_i32_0 = arith.constant 0 : i32
    %c0_i32_1 = arith.constant 0 : i32
    return %c0_i32, %c0_i32_0 : i32, i32
  }
  func.func @transform_3(%arg0: i32) -> (i32, i32, i32) {
    %c0_i32 = arith.constant 0 : i32
    %c0_i32_0 = arith.constant 0 : i32
    %c0_i32_1 = arith.constant 0 : i32
    %c0_i32_2 = arith.constant 0 : i32
    return %c0_i32, %c0_i32_0, %c0_i32_1 : i32, i32, i32
  }
  func.func @transform_4(%arg0: i32) -> (i32, i32) {
    %c0_i32 = arith.constant 0 : i32
    %c0_i32_0 = arith.constant 0 : i32
    %c0_i32_1 = arith.constant 0 : i32
    return %c0_i32, %c0_i32_0 : i32, i32
  }
  func.func @transform_5(%arg0: i32) -> (i32, i32) {
    %c0_i32 = arith.constant 0 : i32
    %c0_i32_0 = arith.constant 0 : i32
    return %c0_i32, %arg0 : i32, i32
  }
}

</mosaic_0001>

<bundles_post_ra>
// kernel: tpu_custom_call.1
= control target key start
LH: loop header
LB: loop body
LE: loop exit
PB: predicated region body
PF: predicated region fallthrough
CT: control target
= control target key end

     0   :  { %10 = vsyncpa [#allocation3], 0  ;;  %s1174_s0 = inlined_call_operand.vmem [shape: f32[8,256], index: 0, kind: input, shape index: {}]   ;;  %s1175_s1 = inlined_call_operand.vmem [shape: f32[32,8], index: 1, kind: input, shape index: {}]   ;;  %s1176_s2 = inlined_call_operand.vmem [shape: f32[32,3], index: 2, kind: input, shape index: {}]   ;;  %s1177_s3 = inlined_call_operand.vmem [shape: f32[2,32,32], index: 3, kind: input, shape index: {}]   ;;  %s1178_s4 = inlined_call_operand.vmem [shape: f32[1,32], index: 4, kind: input, shape index: {}]   ;;  %s1179_s5 = inlined_call_operand.hbm [shape: f32[1,256], index: 5, kind: output, shape index: {}]  }
   0x1   :  { %12 = vsyncpa [#allocation3 + $0x1], 0  ;;  %s1011_s18 = smov 0   ;;  %s1013_s19 = smov 0  }
   0x2   :  { %s1015_s20 = smov 0   ;;  %s1017_s21 = smov 0  }
   0x3 LB: > { %s1032_s22 = sadd.s32 4294967295, %s972_s21   ;;  %s739_s23 = sadd.s32 4294967294, %s972_s21   ;;  %s972_s21 = sphi %s1017_s21, %s1185_s21   ;;  %s968_s20 = sphi %s1015_s20, %s1184_s20   ;;  %s964_s19 = sphi %s1013_s19, %s1183_s19   ;;  %s960_s18 = sphi %s1011_s18, %s1182_s18  }
   0x4   : > { %s1036_s24 = sadd.s32 1, %s972_s21   ;;  %s135_s25 = sadd.s32 1, %s968_s20 }
   0x5   : > { %s132_s26 = ssub.s32 %s972_s21, %s1036_s24  ;;  %p145_p0 = scmp.ne.s32.totalorder %s968_s20, %s964_s19 }
   0x6   : > { %p133_p1 = scmp.eq.s32.totalorder %s132_s26, 0  ;;  %p146_p2 = scmp.eq.s32.totalorder %s1032_s22, 1 }
   0x7   : > { %p151_p3 = scmp.ne.s32.totalorder %s964_s19, %s960_s18  ;;  %p152_p4 = scmp.eq.s32.totalorder %s739_s23, 1 }
   0x8   : > { %s1047_s27 = scalar_select %p133_p1, %s968_s20, %s135_s25  }
   0x9   : > { %p1049_p5 = por %p146_p2, %p145_p0  ;;  %p1053_p6 = por %p152_p4, %p151_p3 }
   0xa   : > { %p742_p7 = scmp.ge.s32.totalorder %s972_s21, 1  ;;  %p189_p8 = scmp.lt.s32.totalorder %s972_s21, 3 }
   0xc   : > { %p190_p9 = pnand %p742_p7, %p189_p8 }
   0xd   : > { %p215_p10 = scmp.lt.s32.totalorder (!%p190_p9), %s1032_s22, 1  ;;  %v219_v0 = vld [vmem:[%s1175_s1] sm:$0xff] (!%p190_p9)  ;;  %vm239_vm0 = vcmask (!%p190_p9), 64512   ;;  %v220_v2 = vld [vmem:[%s1175_s1 + $0x8] sm:$0xff] (!%p190_p9)  ;;  %v221_v3 = vld [vmem:[%s1175_s1 + $0x10] sm:$0xff] (!%p190_p9)  ;;  %vm365_vm1 = vcmask (!%p190_p9), 261120  }
   0xe   : > { %193 = sbr.rel (%p190_p9) target bundleno = 940 (0x3ac), region = 40  ;;  %792 = vmatprep.mubr.msk.f32.mxu0 (!%p190_p9), %vm239_vm0, %v219_v0  ;;  %v222_v4 = vld [vmem:[%s1175_s1 + $0x18] sm:$0xff] (!%p190_p9)  ;;  %v223_v5 = vld [vmem:[%s1177_s3] sm:$0xff] (!%p190_p9)  ;;  %v235_v7 = vld [vmem:[%s1176_s2 + $0x10] sm:$0xff] (!%p190_p9)  ;;  %v974_v8 = vmov (!%p190_p9), 0   ;;  %v975_v29 = vmov (!%p190_p9), 1  }
   0xf   : > { %806 = vmatprep.mubr.msk.f32.mxu1 (!%p190_p9), %vm365_vm1, %v223_v5  ;;  %v233_v6 = vld [vmem:[%s1176_s2] sm:$0xff] (!%p190_p9)  ;;  %904 = vset.pattern.permute.xlu0 (!%p190_p9), %v974_v8  ;;  %v234_v9 = vld [vmem:[%s1176_s2 + $0x8] sm:$0xff] (!%p190_p9)  ;;  %v236_v10 = vld [vmem:[%s1176_s2 + $0x18] sm:$0xff] (!%p190_p9)  ;;  %v976_v55 = vmov (!%p190_p9), 0.0|0.0   ;;  %vm977_vm2 = vmmov (!%p190_p9), 0   ;;  %v978_v56 = vmov (!%p190_p9), 0.0  }
  0x10   : > { %905 = vset.pattern.permute.xlu1 (!%p190_p9), %v974_v8  ;;  %347 = vperm.xlu0 (!%p190_p9), %904, %v233_v6   ;;  %v224_v25 = vld [vmem:[%s1177_s3 + $0x8] sm:$0xff] (!%p190_p9)  ;;  %v225_v26 = vld [vmem:[%s1177_s3 + $0x10] sm:$0xff] (!%p190_p9)  ;;  %v226_v27 = vld [vmem:[%s1177_s3 + $0x18] sm:$0xff] (!%p190_p9)  ;;  %v979_v58 = vmov (!%p190_p9), 2   ;;  %s213_s14 = sand.u32 (!%p190_p9), 1, %s964_s19   ;;  %s761_s15 = sshll.u32 (!%p190_p9), %s1032_s22, 4 }
  0x11   : > { %357 = vperm.xlu1 (!%p190_p9), %905, %v235_v7   ;;  %v744_v28 = vld [vmem:[%s1177_s3 + $0x20] sm:$0xff] (!%p190_p9)  ;;  %v745_v52 = vld [vmem:[%s1177_s3 + $0x28] sm:$0xff] (!%p190_p9)  ;;  %v746_v53 = vld [vmem:[%s1177_s3 + $0x30] sm:$0xff] (!%p190_p9)  ;;  %s214_s16 = scalar_lea.vmem (!%p190_p9), [#allocation2], %s213_s14  ;;  %s1132_s26 = scalar_lea.hbm (!%p190_p9), %s1179_s5, %s761_s15 }
  0x12   : > { %v747_v54 = vld [vmem:[%s1177_s3 + $0x38] sm:$0xff] (!%p190_p9)  ;;  %v237_v57 = vld [vmem:[%s1176_s2] sm:$0x1] (!%p190_p9)  ;;  %s684_s17 = sshll.u32 (!%p190_p9), %s214_s16, 4  ;;  %s672_s30 = scalar_lea.sflag (!%p190_p9), [#allocation3], %s213_s14  ;;  %s1134_s17 = int_to_ptr.vmem [resolvable:$true] %s684_s17 }
  0x13   : > { %s910_s6 = scalar_lea.vmem (!%p190_p9), %s1134_s17, 16 }
  0x14   : > { %352 = vperm.xlu0 (!%p190_p9), %904, %v234_v9   ;;  %p911_p11 = scmp.ne.s32.totalorder (!%p190_p9), %s1134_s17, %s910_s6 }
  0x15   : > { %s216_s7 = scalar_select %p215_p10, %s1032_s22, 1  ;;  %362 = vperm.xlu1 %905, %v236_v10  }
  0x16   : > { %p912_p12 = pnand %p911_p11, %p1049_p5  ;;  %s980_s22 = smov [#allocation2]  }
  0x17   : > { %s743_s8 = sshll.u32 %s216_s7, 3  ;;  %s914_s7 = sshll.u32 %s980_s22, 4  ;;  %s915_s7 = int_to_ptr.vmem [resolvable:$false] %s914_s7 }
  0x18   : > { %s218_s11 = scalar_lea.vmem %s1174_s0, %s743_s8  ;;  %906 = vset.pattern.permute.xlu0 %v975_v29  ;;  %p913_p13 = pneg %p912_p12 }
  0x19   : > { %v238_v1 = vld [vmem:[%s218_s11] sm:$0xff]  ;;  %907 = vset.pattern.permute.xlu1 %v975_v29  ;;  %472 = vperm.xlu0 %906, %v233_v6   ;;  %s916_s8 = scalar_lea.vmem %s915_s7, 32  ;;  %p917_p0 = scmp.lt.s32.totalorder %s1134_s17, %s915_s7 }
  0x1a   : > { %790 = vmatprep.subr.mxu0 %v238_v1  ;;  %476 = vperm.xlu1 %907, %v234_v9   ;;  %p918_p1 = scmp.lt.s32.totalorder %s916_s8, %s910_s6 }
  0x1b   : > { %791 = vmatpush3.msra.mxu0 %v238_v1 }
  0x1c   : > { %793 = vmatmul.mubr.msk.f32.vlgmr.msra.gmra.mrb[0].mxu0 %vm239_vm0, %v220_v2  ;;  %p919_p2 = por %p918_p1, %p917_p0 }
  0x1d   : > { %795 = vmatprep.mubr.msk.f32.mxu0 %vm239_vm0, %v221_v3  ;;  %484 = vperm.xlu0 %906, %v236_v10  }
  0x1e   : > { %480 = vperm.xlu1 %907, %v235_v7   ;;  %p920_p3 = pnand %p919_p2, %p913_p13 }
  0x20   : > { %796 = vmatmul.mubr.msk.f32.gmra.mrb[2].mxu0 %vm239_vm0, %v222_v4 }
  0x21   : > { %820 = vmatprep.mubr.msk.f32.mxu0 %vm365_vm1, %v744_v28  ;;  %909 = vset.pattern.permute.xlu0 %v979_v58 }
  0x22   : > { %908 = vset.pattern.permute.xlu1 %v979_v58 }
  0x23   : > { %594 = vperm.xlu1 %908, %v237_v57  }
  0x8f   : > { %v348_v30 = vpop.permute.xlu0 %347 }
  0x90   : > { %v358_v31 = vpop.permute.xlu1 %357 }
  0x93   : > { %v353_v32 = vpop.permute.xlu0 %352 }
  0x94   : > { %v363_v38 = vpop.permute.xlu1 %362 }
  0x98   : > { %v473_v59 = vpop.permute.xlu0 %472 }
  0x99   : > { %v477_v60 = vpop.permute.xlu1 %476 }
  0x9c   : > { %v485_v2 = vpop.permute.xlu0 %484 }
  0x9d   : > { %v481_v6 = vpop.permute.xlu1 %480 }
  0xef   : > { %v794_v11 = vpop.f32.mrb[0].mxu0 }
  0xf0   : > { %v338_v12 = vmul.f32 0.01, %v794_v11  ;;  %v318_v13 = vpop.f32.mrb[1].mxu0 }
  0xf1   : > { %v337_v14 = vmul.f32 0.01, %v318_v13 }
  0xf2   : > { %v342_v15 = vmax.f32 %v794_v11, %v338_v12 }
  0xf3   : > { %v341_v16 = vmax.f32 %v318_v13, %v337_v14  ;;  %v797_v17 = vpop.f32.mrb[2].mxu0 }
  0xf4   : > { %v340_v18 = vmul.f32 0.01, %v797_v17  ;;  %v328_v19 = vpop.f32.mrb[3].mxu0 }
  0xf5   : > { %v339_v20 = vmul.f32 0.01, %v328_v19  ;;  %v837_v21 = vpack.c.bf16 %v342_v15, %v341_v16 }
  0xf6   : > { %v344_v22 = vmax.f32 %v797_v17, %v340_v18  ;;  %v232_v17 = vld [vmem:[%s1178_s4] sm:$0x1]  ;;  %v595_v18 = vpop.permute.xlu1 %594 }
  0xf7   : > { %v343_v23 = vmax.f32 %v328_v19, %v339_v20  ;;  %838 = vmatprep.subr.bf16.mxu1 %v837_v21 }
  0xf8   : > { %840 = vmatpush3.bf16.msra.mxu1 %v837_v21 }
  0xf9   : > { %v841_v24 = vpack.c.bf16 %v344_v22, %v343_v23 }
  0xfb   : > { %842 = vmatprep.subr.bf16.mxu1 %v841_v24 }
  0xfc   : > { %844 = vmatpush3.bf16.msra.mxu1 %v841_v24 }
  0xfd   : > { %853 = vmatprep.subr.bf16.mxu1 %v976_v55 }
  0xff   : > { %807 = vmatmul.mubr.msk.f32.vlgmr.msra.gmra.mrb[0].mxu1 %vm365_vm1, %v224_v25 }
 0x100   : > { %809 = vmatprep.mubr.msk.f32.mxu1 %vm365_vm1, %v225_v26 }
 0x103   : > { %810 = vmatmul.mubr.msk.f32.gmra.mrb[2].mxu1 %vm365_vm1, %v226_v27 }
 0x104   : > { %834 = vmatprep.mubr.msk.f32.mxu1 %vm977_vm2, %v978_v56 }
 0x1d2   : > { %v808_v33 = vpop.f32.mrb[0].mxu1 }
 0x1d3   : > { %v450_v34 = vadd.f32 %v808_v33, %v353_v32  ;;  %v444_v35 = vpop.f32.mrb[1].mxu1 }
 0x1d4   : > { %v445_v36 = vadd.f32 %v444_v35, %v348_v30 }
 0x1d5   : > { %v464_v37 = vmul.f32 0.01, %v450_v34 }
 0x1d6   : > { %v463_v39 = vmul.f32 0.01, %v445_v36  ;;  %v811_v40 = vpop.f32.mrb[2].mxu1 }
 0x1d7   : > { %v468_v41 = vmax.f32 %v450_v34, %v464_v37  ;;  %v460_v42 = vadd.f32 %v811_v40, %v363_v38  ;;  %v454_v43 = vpop.f32.mrb[3].mxu1 }
 0x1d8   : > { %v467_v44 = vmax.f32 %v445_v36, %v463_v39  ;;  %v455_v45 = vadd.f32 %v454_v43, %v358_v31 }
 0x1d9   : > { %v466_v46 = vmul.f32 0.01, %v460_v42 }
 0x1da   : > { %v465_v47 = vmul.f32 0.01, %v455_v45  ;;  %v845_v48 = vpack.c.bf16 %v468_v41, %v467_v44 }
 0x1db   : > { %v470_v49 = vmax.f32 %v460_v42, %v466_v46 }
 0x1dc   : > { %v469_v50 = vmax.f32 %v455_v45, %v465_v47  ;;  %846 = vmatprep.subr.bf16.mxu0 %v845_v48 }
 0x1dd   : > { %848 = vmatpush3.bf16.msra.mxu0 %v845_v48 }
 0x1de   : > { %v849_v51 = vpack.c.bf16 %v470_v49, %v469_v50 }
 0x1e0   : > { %850 = vmatprep.subr.bf16.mxu0 %v849_v51 }
 0x1e1   : > { %852 = vmatpush3.bf16.msra.mxu0 %v849_v51 }
 0x1e4   : > { %821 = vmatmul.mubr.msk.f32.vlgmr.msra.gmra.mrb[4].mxu0 %vm365_vm1, %v745_v52 }
 0x1e5   : > { %823 = vmatprep.mubr.msk.f32.mxu0 %vm365_vm1, %v746_v53 }
 0x1e8   : > { %824 = vmatmul.mubr.msk.f32.gmra.mrb[6].mxu0 %vm365_vm1, %v747_v54 }
 0x2b7   : > { %v822_v61 = vpop.f32.mrb[4].mxu0 }
 0x2b8   : > { %v571_v62 = vadd.f32 %v822_v61, %v477_v60  ;;  %v565_v63 = vpop.f32.mrb[5].mxu0 }
 0x2b9   : > { %v566_v0 = vadd.f32 %v565_v63, %v473_v59 }
 0x2ba   : > { %v585_v1 = vmul.f32 0.01, %v571_v62 }
 0x2bb   : > { %v584_v3 = vmul.f32 0.01, %v566_v0  ;;  %v825_v4 = vpop.f32.mrb[6].mxu0 }
 0x2bc   : > { %v589_v5 = vmax.f32 %v571_v62, %v585_v1  ;;  %v581_v7 = vadd.f32 %v825_v4, %v485_v2  ;;  %v575_v8 = vpop.f32.mrb[7].mxu0 }
 0x2bd   : > { %v588_v9 = vmax.f32 %v566_v0, %v584_v3  ;;  %v576_v10 = vadd.f32 %v575_v8, %v481_v6 }
 0x2be   : > { %v587_v11 = vmul.f32 0.01, %v581_v7 }
 0x2bf   : > { %v854_v12 = vpack.c.bf16 %v589_v5, %v588_v9  ;;  %v586_v13 = vmul.f32 0.01, %v576_v10 }
 0x2c0   : > { %v591_v14 = vmax.f32 %v581_v7, %v587_v11 }
 0x2c1   : > { %v590_v15 = vmax.f32 %v576_v10, %v586_v13  ;;  %855 = vmatpush3.bf16.msra.mxu1 %v854_v12 }
 0x2c2   : > { %856 = vmatprep.subr.bf16.mxu1 %v976_v55 }
 0x2c3   : > { %v857_v16 = vpack.c.bf16 %v591_v14, %v590_v15 }
 0x2c5   : > { %858 = vmatpush3.bf16.msra.mxu1 %v857_v16 }
 0x2c8   : > { %835 = vmatmul.mubr.msk.f32.vlgmr.msra.gmra.mrb[4].mxu1 %vm365_vm1, %v232_v17 }
 0x39b   : > { %v666_v19 = vpop.f32.mrb[4].mxu1 }
 0x39c   : > { %v667_v20 = vadd.f32 %v666_v19, %v595_v18  ;;  %v836_v21 = vpop.f32.mrb[5].mxu1 }
 0x39e   : > { %670 = vst [vmem:[%s214_s16] sm:$0x1] %v667_v20 }
 0x39f   : > { %923 = shalt.err (!%p920_p3)
}
 0x3a0   : > { %s924_s9 = scalar_lea.hbm %s1132_s26, 16  ;;  %s928_s12 = scalar_lea.hbm %s1179_s5, 32 }
 0x3a1   : > { %p925_p4 = scmp.ne.s32.totalorder %s1132_s26, %s924_s9  ;;  %p929_p9 = scmp.lt.u32.totalorder %s1132_s26, %s1179_s5 }
 0x3a2   : > { %p930_p10 = scmp.lt.u32.totalorder %s928_s12, %s924_s9  ;;  %p932_p12 = scmp.lt.u32.totalorder %s924_s9, %s1132_s26 }
 0x3a3   : > { %p926_p7 = pnand %p925_p4, %p1049_p5 }
 0x3a4   : > { %p931_p11 = por %p930_p10, %p929_p9 }
 0x3a5   : > { %p927_p8 = pneg %p926_p7 }
 0x3a6   : > { %p933_p13 = por %p932_p12, %p931_p11 }
 0x3a8   : > { %p934_p0 = pnand %p933_p13, %p927_p8 }
 0x3aa   : > { %937 = shalt.err (!%p934_p0)
}
 0x3ab   : > { %859 = dma.vmem_to_hbm [thread:$0]  (%p1049_p5), %s1134_s17, 16, %s1132_s26, %s672_s30  }
 0x3ac PF: > { %p865_p1 = scmp.ge.s32.totalorder %s972_s21, 2  ;;  %s696_s15 = sand.u32 1, %s960_s18  }
 0x3ad   : > { %s697_s16 = scalar_lea.sflag [#allocation3], %s696_s15 }
 0x3ae   : > { %p862_p2 = pnand %p865_p1, %p1053_p6 }
 0x3b0   : > { %955 = dma.done.wait (!%p862_p2), %s697_s16, 16  }
 0x3b1   : > { %957 = vsyncadd (!%p862_p2), %s697_s16, 4294967280  ;;  %p15_p3 = scmp.ge.s32.totalorder %s1036_s24, 4   ;;  %s1182_s18 = smov %s964_s19 }
 0x3b2   : > { %s1183_s19 = smov %s968_s20  ;;  %s1184_s20 = smov %s1047_s27 }
 0x3b3   : > { %s1185_s21 = smov %s1036_s24  ;;  %17 = sbr.rel (!%p15_p3) target bundleno = 3 (0x3), region = 76 }
 0x3ba   :  { %701 = vsyncpa [#allocation3], 1 }
 0x3bb   :  { %703 = vsyncpa [#allocation3 + $0x1], 1 }

</bundles_post_ra>
